<compile_context>
chip_gen: v7x
topology: tpu7x:2x2x1
jax: 0.10.0
libtpu: 0.0.40
codegen_flags: <defaults>
</compile_context>

<pallas_src>
import jax
import jax.numpy as jnp
from jax.experimental import pallas as pl
from jax.experimental.pallas import tpu as pltpu


def _round_up(x: int, m: int) -> int:
    return ((x + m - 1) // m) * m


def topic_attention_kernel(lhs_ref, wu_ref, v_ref, onehot_ref, mask_ref, out_ref):
    f32 = jnp.float32
    Bp, Cp = out_ref.shape          # padded batch (x8), padded context lanes (x128)
    Hp = wu_ref.shape[1]            # padded hidden (x128)
    C = onehot_ref.shape[0]         # real context count (static)

    # One fused MXU push: [h | ctx_c] @ [W ; U] = h@W + ctx_c@U  (f32 accumulation).
    proj = jnp.dot(lhs_ref[...], wu_ref[...],
                   preferred_element_type=f32)                     # (C*Bp, Hp)

    # tanh (EUP) + ONE lane reduction against topic_v (XLU); no per-context loop.
    t3 = jnp.tanh(proj).reshape(C, Bp, Hp)                         # (C, Bp, Hp)
    v3 = v_ref[...].reshape(1, 1, Hp)                              # (1, 1, Hp)
    s3 = jnp.sum(t3 * v3, axis=-1, keepdims=True)                  # (C, Bp, 1)

    # Scatter score of context c into lane c of a lane-dense (Bp, Cp) slab:
    # elementwise multiply with a one-hot (C,1,Cp) and sum over the leading axis.
    scores = jnp.sum(s3 * onehot_ref[...], axis=0)                 # (Bp, Cp)

    # masked_fill(pad, -100000) and lane/row padding (-1e30) via one precomputed
    # mask: where the mask is "active" (very negative) it REPLACES the score,
    # exactly like the PyTorch masked_fill_.
    m = mask_ref[...]
    scores = jnp.where(m < -50000.0, m, scores)

    # Softmax over the context lanes with EXACT normalization (rows sum to 1).
    mx = jnp.max(scores, axis=1, keepdims=True)
    e = jnp.exp(scores - mx)
    out_ref[...] = e / jnp.sum(e, axis=1, keepdims=True)


def prepare_topic_attention_params(params, hidden_size, param_dtype=jnp.bfloat16):
    """Once-per-model weight prep: zero-pad to lane-aligned shapes, stack W over U
    into a single (2*Hp, Hp) RHS, and cast to the compute dtype (bf16 default)."""
    H = hidden_size
    Hp = _round_up(H, 128)
    WU = jnp.zeros((2 * Hp, Hp), jnp.float32)
    WU = WU.at[:H, :H].set(params["topic_W"].astype(jnp.float32))
    WU = WU.at[Hp:Hp + H, :H].set(params["topic_U"].astype(jnp.float32))
    v_row = jnp.zeros((1, Hp), jnp.float32).at[0, :H].set(
        params["topic_v"].reshape(H).astype(jnp.float32))
    return {"WU": WU.astype(param_dtype), "v": v_row, "H": H, "Hp": Hp,
            "dtype": param_dtype}


def prepare_topic_attention_mask(pad_matrix):
    """Precompute the (Bp, Cp) score mask: 0 = valid, -100000 = pad_matrix==1,
    -1e30 = lane padding beyond C.  Hoist this out of a decode loop."""
    pad = jnp.asarray(pad_matrix)
    B, C = pad.shape
    Bp = _round_up(max(B, 1), 8)
    Cp = _round_up(max(C, 1), 128)
    mask = jnp.full((Bp, Cp), -1e30, jnp.float32)
    mask = mask.at[:, :C].set(0.0)
    mask = mask.at[:B, :C].set(
        jnp.where(pad > 0, -100000.0, 0.0).astype(jnp.float32))
    return mask


def topic_attention_forward(prep, inputs, hidden, pad_matrix, mask=None):
    """inputs: list of C arrays (1,B,H) or pre-stacked (C,B,H)/(C,1,B,H);
    hidden: (1,B,H); pad_matrix: (B,C). Returns attention weights (B,C)."""
    H, Hp, cd = prep["H"], prep["Hp"], prep["dtype"]
    B = hidden.shape[1]

    if isinstance(inputs, (list, tuple)):
        ctx = jnp.stack([jnp.asarray(x)[0] for x in inputs], axis=0)   # (C, B, H)
    else:
        ctx = jnp.asarray(inputs)
        if ctx.ndim == 4:                                              # (C, 1, B, H)
            ctx = ctx[:, 0]
    C = ctx.shape[0]
    Bp = _round_up(max(B, 1), 8)
    Cp = _round_up(max(C, 1), 128)

    # Fused LHS: rows are [h_b | ctx_{c,b}], zero-padded to (C*Bp, 2*Hp).
    lhs = jnp.zeros((C, Bp, 2 * Hp), cd)
    lhs = lhs.at[:, :B, :H].set(
        jnp.broadcast_to(hidden[0], (C, B, H)).astype(cd))
    lhs = lhs.at[:, :B, Hp:Hp + H].set(ctx.astype(cd))
    lhs = lhs.reshape(C * Bp, 2 * Hp)

    # One-hot lane scatter matrix (C, 1, Cp) and score mask (Bp, Cp).
    onehot = jnp.eye(C, Cp, dtype=jnp.float32).reshape(C, 1, Cp)
    if mask is None:
        mask = prepare_topic_attention_mask(pad_matrix)

    itm = jnp.dtype(cd).itemsize
    io_bytes = ((C * Bp * 2 * Hp) * itm + (2 * Hp * Hp) * itm + Hp * 4
                + C * Cp * 4 + 2 * Bp * Cp * 4)
    scratch_bytes = 3 * C * Bp * Hp * 4 + C * Bp * Cp * 4
    vmem_limit = int(min(48 << 20, max(4 << 20, 2 * (io_bytes + scratch_bytes))))
    cost = pl.CostEstimate(
        flops=2 * (C * Bp) * (2 * Hp) * Hp + 4 * C * Bp * Hp + 3 * Bp * Cp,
        transcendentals=C * Bp * Hp + Bp * Cp,
        bytes_accessed=int(io_bytes))

    # Gridless: all buffers fit VMEM at realistic (B, C, H) for this module.
    # For H >= ~1024 add a K-tiled grid (dimension_semantics=("arbitrary",)) with
    # an f32 accumulator; for large C*Bp on v7x add a leading "parallel" row axis.
    out = pl.pallas_call(
        topic_attention_kernel,
        out_shape=jax.ShapeDtypeStruct((Bp, Cp), jnp.float32),
        in_specs=[pl.BlockSpec(memory_space=pltpu.MemorySpace.VMEM)] * 5,
        out_specs=pl.BlockSpec(memory_space=pltpu.MemorySpace.VMEM),
        compiler_params=pltpu.CompilerParams(vmem_limit_bytes=vmem_limit),
        cost_estimate=cost,
    )(lhs, prep["WU"], prep["v"], onehot, mask)
    return out[:B, :C]


def topic_attention_reference(params, inputs, hidden, pad_matrix):
    """Pure-JAX f32 mirror of the PyTorch forward (for verification)."""
    h = hidden[0]
    dah = h @ params["topic_W"]
    cols = [jnp.tanh(dah + x[0] @ params["topic_U"]) @ params["topic_v"]
            for x in inputs]
    scores = jnp.concatenate(cols, axis=1)
    scores = jnp.where(pad_matrix > 0, -100000.0, scores)
    return jax.nn.softmax(scores, axis=1)


if __name__ == "__main__":
    B, H, C = 2, 32, 4                       # batch, hidden, context size

    key = jax.random.PRNGKey(0)
    kw, ku, kv, kh, kc = jax.random.split(key, 5)
    params = {
        "topic_W": jax.random.normal(kw, (H, H), jnp.float32) * 0.1,
        "topic_U": jax.random.normal(ku, (H, H), jnp.float32) * 0.1,
        "topic_v": jax.random.normal(kv, (H, 1), jnp.float32) * 0.1,
    }

    hidden = jax.random.normal(kh, (1, B, H), jnp.float32)               # (1,B,H)
    ctx_all = jax.random.normal(kc, (C, 1, B, H), jnp.float32)
    inputs = [ctx_all[c] for c in range(C)]                              # C x (1,B,H)
    pad_matrix = jnp.array([[0, 0, 1, 0],
                            [0, 1, 0, 0]], jnp.int32)                    # (B,C)

    ref = topic_attention_reference(params, inputs, hidden, pad_matrix)

    # f32 weights: tight check of the kernel logic against the f32 reference.
    prep32 = prepare_topic_attention_params(params, H, param_dtype=jnp.float32)
    attn32 = topic_attention_forward(prep32, inputs, hidden, pad_matrix)
    jax.block_until_ready(attn32)
    assert attn32.shape == (B, C)
    assert jnp.allclose(attn32, ref, atol=2e-3, rtol=2e-3)
    assert jnp.allclose(jnp.sum(attn32, axis=1), jnp.ones((B,)), atol=1e-5)

    # bf16 weights/activations (production setting): loose check vs f32 reference,
    # exact row-normalization regardless of input dtype.
    prep16 = prepare_topic_attention_params(params, H)                   # bf16
    attn16 = topic_attention_forward(prep16, inputs, hidden, pad_matrix)
    jax.block_until_ready(attn16)
    assert attn16.shape == (B, C)
    assert jnp.allclose(attn16, ref, atol=2e-2, rtol=2e-2)
    assert jnp.allclose(jnp.sum(attn16, axis=1), jnp.ones((B,)), atol=1e-5)

    print("KERNEL_OK")
</pallas_src>

<mosaic_0001>
module attributes {stable_mosaic.version = 11 : i64} {
  func.func @topic_attention_kernel(%arg0: memref<32x256xf32, #tpu.memory_space<vmem>>, %arg1: memref<256x128xf32, #tpu.memory_space<vmem>>, %arg2: memref<1x128xf32, #tpu.memory_space<vmem>>, %arg3: memref<4x1x128xf32, #tpu.memory_space<vmem>>, %arg4: memref<8x128xf32, #tpu.memory_space<vmem>>, %arg5: memref<8x128xf32, #tpu.memory_space<vmem>>) attributes {dimension_semantics = [], scalar_prefetch = 0 : i64, scratch_operands = 0 : i64, tpu.core_type = #tpu.core_type<tc>} {
    %c0 = arith.constant 0 : index
    %c0_0 = arith.constant 0 : index
    %0 = vector.load %arg0[%c0, %c0_0] : memref<32x256xf32, #tpu.memory_space<vmem>>, vector<32x256xf32>
    %c0_1 = arith.constant 0 : index
    %c0_2 = arith.constant 0 : index
    %1 = vector.load %arg1[%c0_1, %c0_2] : memref<256x128xf32, #tpu.memory_space<vmem>>, vector<256x128xf32>
    %cst = arith.constant dense<0.000000e+00> : vector<32x128xf32>
    %2 = tpu.matmul %0, %1, %cst {dimension_numbers = #tpu.dot_dimension_numbers<[1], [0], [0], [1], [0, 0, 1, 1], [], []>} : vector<32x256xf32>, vector<256x128xf32>, vector<32x128xf32> -> vector<32x128xf32>
    %3 = math.tanh %2 : vector<32x128xf32>
    %4 = vector.shape_cast %3 : vector<32x128xf32> to vector<4x8x128xf32>
    %c0_3 = arith.constant 0 : index
    %c0_4 = arith.constant 0 : index
    %5 = vector.load %arg2[%c0_3, %c0_4] : memref<1x128xf32, #tpu.memory_space<vmem>>, vector<1x128xf32>
    %6 = vector.shape_cast %5 : vector<1x128xf32> to vector<1x1x128xf32>
    %7 = vector.broadcast %6 : vector<1x1x128xf32> to vector<4x8x128xf32>
    %8 = arith.mulf %4, %7 : vector<4x8x128xf32>
    %cst_5 = arith.constant dense<0.000000e+00> : vector<4x8xf32>
    %9 = vector.multi_reduction <add>, %8, %cst_5 [2] : vector<4x8x128xf32> to vector<4x8xf32>
    %10 = vector.shape_cast %9 : vector<4x8xf32> to vector<4x8x1xf32>
    %c0_6 = arith.constant 0 : index
    %c0_7 = arith.constant 0 : index
    %c0_8 = arith.constant 0 : index
    %11 = vector.load %arg3[%c0_6, %c0_7, %c0_8] : memref<4x1x128xf32, #tpu.memory_space<vmem>>, vector<4x1x128xf32>
    %12 = vector.broadcast %10 : vector<4x8x1xf32> to vector<4x8x128xf32>
    %13 = vector.broadcast %11 : vector<4x1x128xf32> to vector<4x8x128xf32>
    %14 = arith.mulf %12, %13 : vector<4x8x128xf32>
    %cst_9 = arith.constant dense<0.000000e+00> : vector<8x128xf32>
    %15 = vector.multi_reduction <add>, %14, %cst_9 [0] : vector<4x8x128xf32> to vector<8x128xf32>
    %c0_10 = arith.constant 0 : index
    %c0_11 = arith.constant 0 : index
    %16 = vector.load %arg4[%c0_10, %c0_11] : memref<8x128xf32, #tpu.memory_space<vmem>>, vector<8x128xf32>
    %cst_12 = arith.constant -5.000000e+04 : f32
    %17 = vector.broadcast %cst_12 : f32 to vector<8x128xf32>
    %18 = arith.cmpf olt, %16, %17 : vector<8x128xf32>
    %19 = arith.select %18, %16, %15 : vector<8x128xi1>, vector<8x128xf32>
    %cst_13 = arith.constant dense<0xFF800000> : vector<8xf32>
    %20 = vector.multi_reduction <maximumf>, %19, %cst_13 [1] : vector<8x128xf32> to vector<8xf32>
    %21 = vector.shape_cast %20 : vector<8xf32> to vector<8x1xf32>
    %22 = vector.broadcast %21 : vector<8x1xf32> to vector<8x128xf32>
    %23 = arith.subf %19, %22 : vector<8x128xf32>
    %24 = math.exp %23 : vector<8x128xf32>
    %cst_14 = arith.constant dense<0.000000e+00> : vector<8xf32>
    %25 = vector.multi_reduction <add>, %24, %cst_14 [1] : vector<8x128xf32> to vector<8xf32>
    %26 = vector.shape_cast %25 : vector<8xf32> to vector<8x1xf32>
    %27 = vector.broadcast %26 : vector<8x1xf32> to vector<8x128xf32>
    %28 = arith.divf %24, %27 : vector<8x128xf32>
    %c0_15 = arith.constant 0 : index
    %c0_16 = arith.constant 0 : index
    %29 = vector.load %arg5[%c0_15, %c0_16] : memref<8x128xf32, #tpu.memory_space<vmem>>, vector<8x128xf32>
    tpu.vector_store %arg5[%c0_15, %c0_16], %28 {strides = array<i32>} : memref<8x128xf32, #tpu.memory_space<vmem>>, vector<8x128xf32>,
    return
  }
}

</mosaic_0001>

<bundles_post_ra>
// kernel: tpu_custom_call.1
= control target key start
LH: loop header
LB: loop body
LE: loop exit
PB: predicated region body
PF: predicated region fallthrough
CT: control target
= control target key end

     0   :  { %10 = vsyncpa [#allocation3], 0  ;;  %s540_s0 = inlined_call_operand.hbm [shape: f32[32,256], index: 0, kind: input, shape index: {}]   ;;  %s541_s1 = inlined_call_operand.hbm [shape: f32[256,128], index: 1, kind: input, shape index: {}]   ;;  %s542_s2 = inlined_call_operand.vmem [shape: f32[1,128], index: 2, kind: input, shape index: {}]   ;;  %s543_s3 = inlined_call_operand.vmem [shape: f32[4,1,128], index: 3, kind: input, shape index: {}]   ;;  %s544_s4 = inlined_call_operand.vmem [shape: f32[8,128], index: 4, kind: input, shape index: {}]   ;;  %s545_s5 = inlined_call_operand.hbm [shape: f32[8,128], index: 5, kind: output, shape index: {}]  }
   0x1   :  { %11 = vsyncpa [#allocation6], 0 }
   0x2   :  { %12 = vsyncpa [#allocation4], 0  ;;  %s449_s18 = smov [#allocation2]   ;;  %s377_s22 = scalar_lea.hbm %s540_s0, 1024 }
   0x3   :  { %s18_s19 = sshll.u32 %s449_s18, 4  ;;  %p378_p0 = scmp.ne.s32.totalorder %s540_s0, %s377_s22  ;;  %s19_s19 = int_to_ptr.vmem [resolvable:$true] %s18_s19 }
   0x4   :  { %p381_p1 = scmp.lt.u32.totalorder %s377_s22, %s540_s0 }
   0x6   :  { %p383_p2 = pnand %p381_p1, %p378_p0 }
   0x8   :  { %386 = shalt.err (!%p383_p2)
}
   0x9   :  { %s387_s27 = scalar_lea.vmem %s19_s19, 1024  ;;  %p392_p4 = scmp.lt.s32.totalorder %s19_s19, %s19_s19 }
   0xa   :  { %p388_p3 = scmp.ne.s32.totalorder %s19_s19, %s387_s27  ;;  %p393_p5 = scmp.lt.s32.totalorder %s387_s27, %s387_s27 }
   0xc   :  { %p394_p6 = por %p393_p5, %p392_p4 }
   0xe   :  { %p395_p7 = pnand %p394_p6, %p388_p3 }
  0x10   :  { %398 = shalt.err (!%p395_p7)
}
  0x11   :  { %s450_s28 = smov 256   ;;  %s451_s29 = smov 16  }
  0x12   :  { %24 = dma.hbm_to_vmem [thread:$0]  %s540_s0, 1024, %s19_s19, [#allocation3], %s450_s28, %s450_s28, %s451_s29  }
  0x13   :  { %s452_s7 = smov [#allocation5]   ;;  %s399_s11 = scalar_lea.hbm %s541_s1, 4096 }
  0x14   :  { %s30_s8 = sshll.u32 %s452_s7, 4  ;;  %p400_p8 = scmp.ne.s32.totalorder %s541_s1, %s399_s11  ;;  %s31_s8 = int_to_ptr.vmem [resolvable:$true] %s30_s8 }
  0x15   :  { %p403_p9 = scmp.lt.u32.totalorder %s399_s11, %s541_s1 }
  0x17   :  { %p405_p10 = pnand %p403_p9, %p400_p8 }
  0x19   :  { %408 = shalt.err (!%p405_p10)
}
  0x1a   :  { %s409_s16 = scalar_lea.vmem %s31_s8, 4096  ;;  %p414_p12 = scmp.lt.s32.totalorder %s31_s8, %s31_s8 }
  0x1b   :  { %p410_p11 = scmp.ne.s32.totalorder %s31_s8, %s409_s16  ;;  %p415_p13 = scmp.lt.s32.totalorder %s409_s16, %s409_s16 }
  0x1d   :  { %p416_p0 = por %p415_p13, %p414_p12 }
  0x1f   :  { %p417_p1 = pnand %p416_p0, %p410_p11 }
  0x21   :  { %420 = shalt.err (!%p417_p1)
}
  0x22   :  { %s453_s0 = smov 128   ;;  %s454_s17 = smov 8  }
  0x23   :  { %36 = dma.hbm_to_vmem [thread:$0]  %s541_s1, 4096, %s31_s8, [#allocation6], %s453_s0, %s453_s0, %s454_s17  }
  0x24   :  { %443 = dma.done.wait [#allocation3], 1024  }
  0x25   :  { %444 = vsyncadd [#allocation3], 4294966272 }
  0x26   :  { %445 = dma.done.wait [#allocation6], 4096  }
  0x27   :  { %446 = vsyncadd [#allocation6], 4294963200  ;;  %v73_v0 = vld [vmem:[#allocation5 + $0x80] sm:$0xff]  ;;  %v74_v1 = vld [vmem:[#allocation5 + $0x88] sm:$0xff] }
  0x28   :  { %v57_v2 = vld [vmem:[#allocation5] sm:$0xff]  ;;  %v310_v3 = vpack.c.bf16 %v74_v1, %v73_v0  ;;  %v58_v4 = vld [vmem:[#allocation5 + $0x8] sm:$0xff]  ;;  %v75_v5 = vld [vmem:[#allocation5 + $0x90] sm:$0xff] }
  0x29   :  { %v76_v6 = vld [vmem:[#allocation5 + $0x98] sm:$0xff]  ;;  %v312_v7 = vpack.c.bf16 %v58_v4, %v57_v2  ;;  %v59_v9 = vld [vmem:[#allocation5 + $0x10] sm:$0xff]  ;;  %v77_v11 = vld [vmem:[#allocation5 + $0xa0] sm:$0xff] }
  0x2a   :  { %v314_v8 = vpack.c.bf16 %v76_v6, %v75_v5  ;;  %v60_v10 = vld [vmem:[#allocation5 + $0x18] sm:$0xff]  ;;  %311 = vmatprep.subr.bf16.mxu0 %v310_v3  ;;  %342 = vmatprep.subr.bf16.mxu1 %v310_v3  ;;  %v78_v12 = vld [vmem:[#allocation5 + $0xa8] sm:$0xff]  ;;  %v61_v15 = vld [vmem:[#allocation5 + $0x20] sm:$0xff] }
  0x2b   :  { %313 = vmatpush3.bf16.msra.mxu0 %v312_v7  ;;  %350 = vmatpush3.bf16.msra.mxu1 %v312_v7  ;;  %v316_v13 = vpack.c.bf16 %v60_v10, %v59_v9  ;;  %v318_v14 = vpack.c.bf16 %v78_v12, %v77_v11  ;;  %v62_v16 = vld [vmem:[#allocation5 + $0x28] sm:$0xff]  ;;  %v79_v17 = vld [vmem:[#allocation5 + $0xb0] sm:$0xff]  ;;  %v80_v18 = vld [vmem:[#allocation5 + $0xb8] sm:$0xff] }
  0x2c   :  { %315 = vmatprep.subr.bf16.mxu0 %v314_v8  ;;  %343 = vmatprep.subr.bf16.mxu1 %v314_v8  ;;  %v320_v19 = vpack.c.bf16 %v62_v16, %v61_v15  ;;  %v322_v20 = vpack.c.bf16 %v80_v18, %v79_v17  ;;  %v63_v21 = vld [vmem:[#allocation5 + $0x30] sm:$0xff]  ;;  %v64_v22 = vld [vmem:[#allocation5 + $0x38] sm:$0xff]  ;;  %v81_v23 = vld [vmem:[#allocation5 + $0xc0] sm:$0xff] }
  0x2d   :  { %v82_v24 = vld [vmem:[#allocation5 + $0xc8] sm:$0xff]  ;;  %v324_v27 = vpack.c.bf16 %v64_v22, %v63_v21  ;;  %v65_v29 = vld [vmem:[#allocation5 + $0x40] sm:$0xff]  ;;  %v83_v31 = vld [vmem:[#allocation5 + $0xd0] sm:$0xff] }
  0x2e   :  { %v50_v25 = vld [vmem:[#allocation2 + $0x8] sm:$0xff]  ;;  %v326_v28 = vpack.c.bf16 %v82_v24, %v81_v23  ;;  %v84_v32 = vld [vmem:[#allocation5 + $0xd8] sm:$0xff]  ;;  %v67_v35 = vld [vmem:[#allocation5 + $0x50] sm:$0xff] }
  0x2f   :  { %317 = vmatpush3.bf16.msra.mxu0 %v316_v13  ;;  %351 = vmatpush3.bf16.msra.mxu1 %v316_v13  ;;  %v54_v26 = vld [vmem:[#allocation2 + $0x28] sm:$0xff]  ;;  %v330_v34 = vpack.c.bf16 %v84_v32, %v83_v31  ;;  %v68_v36 = vld [vmem:[#allocation5 + $0x58] sm:$0xff]  ;;  %v85_v37 = vld [vmem:[#allocation5 + $0xe0] sm:$0xff] }
  0x30   :  { %319 = vmatprep.subr.bf16.mxu0 %v318_v14  ;;  %344 = vmatprep.subr.bf16.mxu1 %v318_v14  ;;  %v66_v30 = vld [vmem:[#allocation5 + $0x48] sm:$0xff]  ;;  %v332_v39 = vpack.c.bf16 %v68_v36, %v67_v35  ;;  %v69_v41 = vld [vmem:[#allocation5 + $0x60] sm:$0xff]  ;;  %v87_v43 = vld [vmem:[#allocation5 + $0xf0] sm:$0xff] }
  0x31   :  { %153 = vmatprep.mubr.f32.mxu0 %v50_v25  ;;  %163 = vmatprep.mubr.f32.mxu1 %v54_v26  ;;  %v328_v33 = vpack.c.bf16 %v66_v30, %v65_v29  ;;  %v86_v38 = vld [vmem:[#allocation5 + $0xe8] sm:$0xff]  ;;  %v88_v44 = vld [vmem:[#allocation5 + $0xf8] sm:$0xff]  ;;  %v71_v47 = vld [vmem:[#allocation5 + $0x70] sm:$0xff] }
  0x32   :  { %v334_v40 = vpack.c.bf16 %v86_v38, %v85_v37  ;;  %v70_v42 = vld [vmem:[#allocation5 + $0x68] sm:$0xff]  ;;  %v338_v46 = vpack.c.bf16 %v88_v44, %v87_v43  ;;  %v72_v48 = vld [vmem:[#allocation5 + $0x78] sm:$0xff]  ;;  %v49_v50 = vld [vmem:[#allocation2] sm:$0xff] }
  0x33   :  { %321 = vmatpush3.bf16.msra.mxu0 %v320_v19  ;;  %352 = vmatpush3.bf16.msra.mxu1 %v320_v19  ;;  %v336_v45 = vpack.c.bf16 %v70_v42, %v69_v41  ;;  %v340_v49 = vpack.c.bf16 %v72_v48, %v71_v47  ;;  %v53_v51 = vld [vmem:[#allocation2 + $0x20] sm:$0xff]  ;;  %v52_v52 = vld [vmem:[#allocation2 + $0x18] sm:$0xff]  ;;  %v51_v54 = vld [vmem:[#allocation2 + $0x10] sm:$0xff] }
  0x34   :  { %323 = vmatprep.subr.bf16.mxu0 %v322_v20  ;;  %345 = vmatprep.subr.bf16.mxu1 %v322_v20  ;;  %v56_v53 = vld [vmem:[#allocation2 + $0x38] sm:$0xff]  ;;  %v55_v55 = vld [vmem:[#allocation2 + $0x30] sm:$0xff]  ;;  %v261_v4 = vld [vmem:[%s542_s2] ss:$0 sm:$0xff] }
  0x35   :  { %v262_v15 = vld [vmem:[%s543_s3] ss:$0 sm:$0xff]  ;;  %v263_v16 = vld [vmem:[%s543_s3 + $0x1] ss:$0 sm:$0xff]  ;;  %v264_v17 = vld [vmem:[%s543_s3 + $0x2] ss:$0 sm:$0xff] }
  0x36   :  { %v265_v19 = vld [vmem:[%s543_s3 + $0x3] ss:$0 sm:$0xff]  ;;  %s455_s3 = smov [#allocation7]  }
  0x37   :  { %325 = vmatpush3.bf16.msra.mxu0 %v324_v27  ;;  %353 = vmatpush3.bf16.msra.mxu1 %v324_v27  ;;  %v232_v26 = vld [vmem:[%s544_s4] sm:$0xff]  ;;  %s251_s30 = sshll.u32 %s455_s3, 4  ;;  %s252_s30 = int_to_ptr.vmem [resolvable:$true] %s251_s30 }
  0x38   :  { %327 = vmatprep.subr.bf16.mxu0 %v326_v28  ;;  %346 = vmatprep.subr.bf16.mxu1 %v326_v28  ;;  %vm233_vm0 = vcmp.lt.f32.partialorder %v232_v26, -50000.0  ;;  %s421_s4 = scalar_lea.vmem %s252_s30, 128  ;;  %p426_p3 = scmp.lt.s32.totalorder %s252_s30, %s252_s30 }
  0x39   :  { %p422_p2 = scmp.ne.s32.totalorder %s252_s30, %s421_s4  ;;  %p427_p4 = scmp.lt.s32.totalorder %s421_s4, %s421_s4 }
  0x3b   :  { %329 = vmatpush3.bf16.msra.mxu0 %v328_v33  ;;  %354 = vmatpush3.bf16.msra.mxu1 %v328_v33  ;;  %p428_p5 = por %p427_p4, %p426_p3 }
  0x3c   :  { %331 = vmatprep.subr.bf16.mxu0 %v330_v34  ;;  %347 = vmatprep.subr.bf16.mxu1 %v330_v34 }
  0x3d   :  { %p429_p6 = pnand %p428_p5, %p422_p2 }
  0x3f   :  { %333 = vmatpush3.bf16.msra.mxu0 %v332_v39  ;;  %355 = vmatpush3.bf16.msra.mxu1 %v332_v39 }
  0x40   :  { %335 = vmatprep.subr.bf16.mxu0 %v334_v40  ;;  %348 = vmatprep.subr.bf16.mxu1 %v334_v40 }
  0x43   :  { %337 = vmatpush3.bf16.msra.mxu0 %v336_v45  ;;  %356 = vmatpush3.bf16.msra.mxu1 %v336_v45 }
  0x44   :  { %339 = vmatprep.subr.bf16.mxu0 %v338_v46  ;;  %349 = vmatprep.subr.bf16.mxu1 %v338_v46 }
  0x47   :  { %341 = vmatpush3.bf16.msra.mxu0 %v340_v49  ;;  %357 = vmatpush3.bf16.msra.mxu1 %v340_v49 }
  0x4a   :  { %154 = vmatmul.mubr.f32.vlgmr.msra.gmra.mrb[0].mxu0 %v49_v50  ;;  %164 = vmatmul.mubr.f32.vlgmr.msra.gmra.mrb[0].mxu1 %v53_v51 }
  0x4b   :  { %158 = vmatprep.mubr.f32.mxu0 %v52_v52  ;;  %168 = vmatprep.mubr.f32.mxu1 %v56_v53 }
  0x4e   :  { %159 = vmatmul.mubr.f32.gmra.mrb[2].mxu0 %v51_v54  ;;  %169 = vmatmul.mubr.f32.gmra.mrb[2].mxu1 %v55_v55 }
 0x11d   :  { %v298_v56 = vpop.f32.mrb[0].mxu0  ;;  %v304_v57 = vpop.f32.mrb[0].mxu1 }
 0x11e   :  { %v299_v58 = vpop.f32.mrb[1].mxu0  ;;  %v305_v59 = vpop.f32.mrb[1].mxu1 }
 0x11f   :  { %v300_v60 = vadd.f32 %v299_v58, %v298_v56  ;;  %v306_v61 = vadd.f32 %v305_v59, %v304_v57 }
 0x121   :  { %365 = vtanh.f32 %v300_v60  ;;  %v301_v62 = vpop.f32.mrb[2].mxu0  ;;  %v307_v63 = vpop.f32.mrb[2].mxu1 }
 0x122   :  { %367 = vtanh.f32 %v306_v61  ;;  %v302_v0 = vpop.f32.mrb[3].mxu0  ;;  %v308_v1 = vpop.f32.mrb[3].mxu1 }
 0x123   :  { %v303_v2 = vadd.f32 %v302_v0, %v301_v62  ;;  %v309_v3 = vadd.f32 %v308_v1, %v307_v63 }
 0x125   :  { %369 = vtanh.f32 %v303_v2 }
 0x126   :  { %371 = vtanh.f32 %v309_v3 }
 0x12b   :  { %v366_v5 = vpop.eup %365 }
 0x12c   :  { %v368_v6 = vpop.eup %367  ;;  %v185_v7 = vmul.f32 %v366_v5, %v261_v4 }
 0x12d   :  { %v187_v8 = vmul.f32 %v368_v6, %v261_v4 }
 0x12e   :  { %189 = vadd.xlane.f32.xlu0 %v185_v7 }
 0x12f   :  { %v370_v9 = vpop.eup %369  ;;  %193 = vadd.xlane.f32.xlu1 %v187_v8 }
 0x130   :  { %v372_v10 = vpop.eup %371  ;;  %v186_v11 = vmul.f32 %v370_v9, %v261_v4 }
 0x131   :  { %v188_v12 = vmul.f32 %v372_v10, %v261_v4 }
 0x132   :  { %191 = vadd.xlane.f32.xlu0 %v186_v11 }
 0x133   :  { %195 = vadd.xlane.f32.xlu1 %v188_v12 }
 0x1bb   :  { %v190_v13 = vpop.xlane.xlu0 %189 }
 0x1bc   :  { %v194_v14 = vpop.xlane.xlu1 %193  ;;  %v225_v20 = vmul.f32 %v262_v15, %v190_v13 }
 0x1bd   :  { %v227_v23 = vmul.f32 %v264_v17, %v194_v14 }
 0x1bf   :  { %v192_v18 = vpop.xlane.xlu0 %191 }
 0x1c0   :  { %v226_v21 = vmul.f32 %v263_v16, %v192_v18  ;;  %v196_v22 = vpop.xlane.xlu1 %195 }
 0x1c1   :  { %v228_v25 = vmul.f32 %v265_v19, %v196_v22 }
 0x1c2   :  { %v229_v24 = vadd.f32 %v226_v21, %v225_v20 }
 0x1c4   :  { %v230_v27 = vadd.f32 %v229_v24, %v227_v23 }
 0x1c6   :  { %v231_v28 = vadd.f32 %v230_v27, %v228_v25 }
 0x1c8   :  { %v234_v29 = vsel %vm233_vm0, %v232_v26, %v231_v28 }
 0x1c9   :  { %235 = vmax.xlane.f32.xlu0 %v234_v29 }
 0x256   :  { %v236_v30 = vpop.xlane.xlu0 %235 }
 0x257   :  { %v237_v31 = vsub.f32 %v234_v29, %v236_v30 }
 0x259   :  { %v238_v32 = vmul.f32 1.442695, %v237_v31 }
 0x25b   :  { %373 = vpow2.f32 %v238_v32 }
 0x265   :  { %v374_v33 = vpop.eup %373 }
 0x266   :  { %240 = vadd.xlane.f32.xlu1 %v374_v33 }
 0x2f3   :  { %v241_v34 = vpop.xlane.xlu1 %240 }
 0x2f4   :  { %375 = vrcp.f32 %v241_v34 }
 0x2fe   :  { %v376_v35 = vpop.eup %375 }
 0x2ff   :  { %v243_v36 = vmul.f32 %v376_v35, %v374_v33 }
 0x301   :  { %244 = vst [vmem:[#allocation7] sm:$0xff] %v243_v36 }
 0x302   :  { %432 = shalt.err (!%p429_p6)
}
 0x303   :  { %s433_s8 = scalar_lea.hbm %s545_s5, 128 }
 0x304   :  { %p434_p7 = scmp.ne.s32.totalorder %s545_s5, %s433_s8  ;;  %p437_p8 = scmp.lt.u32.totalorder %s433_s8, %s545_s5 }
 0x306   :  { %p439_p9 = pnand %p437_p8, %p434_p7 }
 0x308   :  { %442 = shalt.err (!%p439_p9)
}
 0x309   :  { %254 = dma.vmem_to_hbm [thread:$0]  %s252_s30, 128, %s545_s5, [#allocation4]  }
 0x30a   :  { %447 = dma.done.wait [#allocation4], 128  }
 0x30b   :  { %448 = vsyncadd [#allocation4], 4294967168 }
 0x30c   :  { %258 = vsyncpa [#allocation3], 1 }
 0x30d   :  { %259 = vsyncpa [#allocation6], 1 }
 0x30e   :  { %260 = vsyncpa [#allocation4], 1 }

</bundles_post_ra>
